<compile_context>
chip_gen: v7x
topology: tpu7x:2x2x1
jax: 0.10.0
libtpu: 0.0.40
codegen_flags: <defaults>
</compile_context>

<pallas_src>
import functools

import jax
import jax.numpy as jnp
from jax.experimental import pallas as pl
from jax.experimental.pallas import tpu as pltpu


def _round_up(x, m):
    return ((x + m - 1) // m) * m


def fnn_kernel(x_ref, w1_ref, b1_ref, w2_ref, b2_ref, o_ref):
    # x_ref:  (tm, Ep)  bf16
    # w1_ref: (Ep, Hp)  bf16    b1_ref: (1, Hp) f32
    # w2_ref: (Hp, Ep)  bf16    b2_ref: (1, Ep) f32
    # o_ref:  (tm, Ep)  f32
    h = jnp.dot(x_ref[...], w1_ref[...], preferred_element_type=jnp.float32)
    h = jnp.maximum(h + b1_ref[...], 0.0)          # bias + ReLU in f32
    o = jnp.dot(h.astype(w2_ref.dtype), w2_ref[...],
                preferred_element_type=jnp.float32)
    # Dropout in eval mode == identity.
    o_ref[...] = o + b2_ref[...]


@functools.partial(jax.jit, static_argnames=("tm",))
def fnn_forward(x, w1, b1, w2, b2, tm=256):
    """x: (B, T, n_embd) -> (B, T, n_embd). Weights are (in, out)."""
    B, T, n_embd = x.shape
    hidden = w1.shape[1]
    M = B * T

    # Lane-dense padded sizes (exact: zero pads contribute nothing).
    Ep = _round_up(n_embd, 128)
    Hp = _round_up(hidden, 128)
    Mp = _round_up(M, tm)

    # bf16 operands for the MXU; biases kept f32.
    x2d = jnp.zeros((Mp, Ep), jnp.bfloat16).at[:M, :n_embd].set(
        x.reshape(M, n_embd).astype(jnp.bfloat16))
    w1p = jnp.zeros((Ep, Hp), jnp.bfloat16).at[:n_embd, :hidden].set(
        w1.astype(jnp.bfloat16))
    w2p = jnp.zeros((Hp, Ep), jnp.bfloat16).at[:hidden, :n_embd].set(
        w2.astype(jnp.bfloat16))
    b1p = jnp.zeros((1, Hp), jnp.float32).at[0, :hidden].set(
        b1.astype(jnp.float32))
    b2p = jnp.zeros((1, Ep), jnp.float32).at[0, :n_embd].set(
        b2.astype(jnp.float32))

    grid = (Mp // tm,)

    # VMEM budget: double-buffered x/out tiles + resident weights/biases
    # (BlockSpec double-buffers everything), with headroom.
    vmem_bytes = (
        2 * tm * Ep * 2            # x tiles (bf16)
        + 2 * tm * Ep * 4          # out tiles (f32)
        + 2 * (Ep * Hp + Hp * Ep) * 2   # W1 + W2 (bf16)
        + 2 * (Hp + Ep) * 4        # biases (f32)
    )
    vmem_limit = min(max(int(vmem_bytes * 1.5) + (4 << 20), 16 << 20), 64 << 20)

    cost = pl.CostEstimate(
        flops=4 * Mp * Ep * Hp,        # two matmuls
        transcendentals=0,
        bytes_accessed=(Mp * Ep * 2 + Mp * Ep * 4
                        + (Ep * Hp + Hp * Ep) * 2 + (Hp + Ep) * 4),
    )

    out2d = pl.pallas_call(
        fnn_kernel,
        out_shape=jax.ShapeDtypeStruct((Mp, Ep), jnp.float32),
        grid_spec=pltpu.PrefetchScalarGridSpec(
            num_scalar_prefetch=0,
            grid=grid,
            in_specs=[
                pl.BlockSpec((tm, Ep), lambda i: (i, 0)),    # x row tile
                pl.BlockSpec((Ep, Hp), lambda i: (0, 0)),    # W1 (resident)
                pl.BlockSpec((1, Hp), lambda i: (0, 0)),     # b1
                pl.BlockSpec((Hp, Ep), lambda i: (0, 0)),    # W2 (resident)
                pl.BlockSpec((1, Ep), lambda i: (0, 0)),     # b2
            ],
            out_specs=pl.BlockSpec((tm, Ep), lambda i: (i, 0)),
        ),
        compiler_params=pltpu.CompilerParams(
            dimension_semantics=("parallel",),
            vmem_limit_bytes=vmem_limit),
        cost_estimate=cost,
    )(x2d, w1p, b1p, w2p, b2p)

    out = out2d[:M, :n_embd].reshape(B, T, n_embd)
    return out.astype(x.dtype)


def init_params(key, n_embd):
    """Deterministic parameter init matching nn.Linear shapes.

    PyTorch nn.Linear(in, out) has weight (out, in); we store the transpose
    (in, out) so the kernel computes x @ W directly.
    """
    hidden = 4 * n_embd
    k1, k2, k3, k4 = jax.random.split(key, 4)
    bound1 = 1.0 / (n_embd ** 0.5)
    bound2 = 1.0 / (hidden ** 0.5)
    w1 = jax.random.uniform(k1, (n_embd, hidden), jnp.float32, -bound1, bound1)
    b1 = jax.random.uniform(k2, (hidden,), jnp.float32, -bound1, bound1)
    w2 = jax.random.uniform(k3, (hidden, n_embd), jnp.float32, -bound2, bound2)
    b2 = jax.random.uniform(k4, (n_embd,), jnp.float32, -bound2, bound2)
    return w1, b1, w2, b2


if __name__ == "__main__":
    n_embd = 32          # -> hidden = 128
    dropout = 0.0        # eval-mode / identity
    B, T = 2, 8

    key = jax.random.PRNGKey(0)
    kx, kp = jax.random.split(key)
    x = jax.random.normal(kx, (B, T, n_embd), dtype=jnp.float32)
    w1, b1, w2, b2 = init_params(kp, n_embd)

    out = fnn_forward(x, w1, b1, w2, b2)
    out = jax.block_until_ready(out)

    # Reference with the same bf16/f32 mixed precision as the kernel.
    xb = x.reshape(-1, n_embd).astype(jnp.bfloat16)
    h = jnp.dot(xb, w1.astype(jnp.bfloat16),
                preferred_element_type=jnp.float32) + b1
    h = jnp.maximum(h, 0.0)
    ref = jnp.dot(h.astype(jnp.bfloat16), w2.astype(jnp.bfloat16),
                  preferred_element_type=jnp.float32) + b2
    ref = ref.reshape(B, T, n_embd)

    assert out.shape == (B, T, n_embd)
    assert jnp.allclose(out, ref, atol=2e-2, rtol=2e-2)

    print("KERNEL_OK")
</pallas_src>

<mosaic_0001>
module attributes {stable_mosaic.version = 11 : i64} {
  func.func @fnn_kernel(%arg0: i32, %arg1: memref<256x128xbf16, #tpu.memory_space<vmem>>, %arg2: memref<128x128xbf16, #tpu.memory_space<vmem>>, %arg3: memref<1x128xf32, #tpu.memory_space<vmem>>, %arg4: memref<128x128xbf16, #tpu.memory_space<vmem>>, %arg5: memref<1x128xf32, #tpu.memory_space<vmem>>, %arg6: memref<256x128xf32, #tpu.memory_space<vmem>>) attributes {dimension_semantics = [#tpu.dimension_semantics<parallel>], iteration_bounds = array<i64: 1>, scalar_prefetch = 0 : i64, scratch_operands = 0 : i64, tpu.core_type = #tpu.core_type<tc>, window_params = [{transform_indices = @transform_0, window_bounds = array<i64: 256, 128>}, {pipeline_mode = #tpu.pipeline_mode<synchronous>, transform_indices = @transform_1, window_bounds = array<i64: 128, 128>}, {pipeline_mode = #tpu.pipeline_mode<synchronous>, transform_indices = @transform_2, window_bounds = array<i64: 1, 128>}, {pipeline_mode = #tpu.pipeline_mode<synchronous>, transform_indices = @transform_3, window_bounds = array<i64: 128, 128>}, {pipeline_mode = #tpu.pipeline_mode<synchronous>, transform_indices = @transform_4, window_bounds = array<i64: 1, 128>}, {transform_indices = @transform_5, window_bounds = array<i64: 256, 128>}]} {
    %c0 = arith.constant 0 : index
    %c0_0 = arith.constant 0 : index
    %0 = vector.load %arg1[%c0, %c0_0] : memref<256x128xbf16, #tpu.memory_space<vmem>>, vector<256x128xbf16>
    %c0_1 = arith.constant 0 : index
    %c0_2 = arith.constant 0 : index
    %1 = vector.load %arg2[%c0_1, %c0_2] : memref<128x128xbf16, #tpu.memory_space<vmem>>, vector<128x128xbf16>
    %cst = arith.constant dense<0.000000e+00> : vector<256x128xf32>
    %2 = tpu.matmul %0, %1, %cst {dimension_numbers = #tpu.dot_dimension_numbers<[1], [0], [0], [1], [0, 0, 1, 1], [], []>} : vector<256x128xbf16>, vector<128x128xbf16>, vector<256x128xf32> -> vector<256x128xf32>
    %c0_3 = arith.constant 0 : index
    %c0_4 = arith.constant 0 : index
    %3 = vector.load %arg3[%c0_3, %c0_4] : memref<1x128xf32, #tpu.memory_space<vmem>>, vector<1x128xf32>
    %4 = vector.broadcast %3 : vector<1x128xf32> to vector<256x128xf32>
    %5 = arith.addf %2, %4 : vector<256x128xf32>
    %cst_5 = arith.constant 0.000000e+00 : f32
    %6 = vector.broadcast %cst_5 : f32 to vector<256x128xf32>
    %7 = arith.maximumf %5, %6 : vector<256x128xf32>
    %8 = arith.truncf %7 : vector<256x128xf32> to vector<256x128xbf16>
    %c0_6 = arith.constant 0 : index
    %c0_7 = arith.constant 0 : index
    %9 = vector.load %arg4[%c0_6, %c0_7] : memref<128x128xbf16, #tpu.memory_space<vmem>>, vector<128x128xbf16>
    %cst_8 = arith.constant dense<0.000000e+00> : vector<256x128xf32>
    %10 = tpu.matmul %8, %9, %cst_8 {dimension_numbers = #tpu.dot_dimension_numbers<[1], [0], [0], [1], [0, 0, 1, 1], [], []>} : vector<256x128xbf16>, vector<128x128xbf16>, vector<256x128xf32> -> vector<256x128xf32>
    %c0_9 = arith.constant 0 : index
    %c0_10 = arith.constant 0 : index
    %11 = vector.load %arg5[%c0_9, %c0_10] : memref<1x128xf32, #tpu.memory_space<vmem>>, vector<1x128xf32>
    %12 = vector.broadcast %11 : vector<1x128xf32> to vector<256x128xf32>
    %13 = arith.addf %10, %12 : vector<256x128xf32>
    %c0_11 = arith.constant 0 : index
    %c0_12 = arith.constant 0 : index
    %14 = vector.load %arg6[%c0_11, %c0_12] : memref<256x128xf32, #tpu.memory_space<vmem>>, vector<256x128xf32>
    tpu.vector_store %arg6[%c0_11, %c0_12], %13 {strides = array<i32>} : memref<256x128xf32, #tpu.memory_space<vmem>>, vector<256x128xf32>,
    return
  }
  func.func @transform_0(%arg0: i32) -> (i32, i32) {
    %c0_i32 = arith.constant 0 : i32
    %c0_i32_0 = arith.constant 0 : i32
    return %arg0, %c0_i32 : i32, i32
  }
  func.func @transform_1(%arg0: i32) -> (i32, i32) {
    %c0_i32 = arith.constant 0 : i32
    %c0_i32_0 = arith.constant 0 : i32
    %c0_i32_1 = arith.constant 0 : i32
    return %c0_i32, %c0_i32_0 : i32, i32
  }
  func.func @transform_2(%arg0: i32) -> (i32, i32) {
    %c0_i32 = arith.constant 0 : i32
    %c0_i32_0 = arith.constant 0 : i32
    %c0_i32_1 = arith.constant 0 : i32
    return %c0_i32, %c0_i32_0 : i32, i32
  }
  func.func @transform_3(%arg0: i32) -> (i32, i32) {
    %c0_i32 = arith.constant 0 : i32
    %c0_i32_0 = arith.constant 0 : i32
    %c0_i32_1 = arith.constant 0 : i32
    return %c0_i32, %c0_i32_0 : i32, i32
  }
  func.func @transform_4(%arg0: i32) -> (i32, i32) {
    %c0_i32 = arith.constant 0 : i32
    %c0_i32_0 = arith.constant 0 : i32
    %c0_i32_1 = arith.constant 0 : i32
    return %c0_i32, %c0_i32_0 : i32, i32
  }
  func.func @transform_5(%arg0: i32) -> (i32, i32) {
    %c0_i32 = arith.constant 0 : i32
    %c0_i32_0 = arith.constant 0 : i32
    return %arg0, %c0_i32 : i32, i32
  }
}

</mosaic_0001>

<bundles_post_ra>
// kernel: fnn_forward.1
= control target key start
LH: loop header
LB: loop body
LE: loop exit
PB: predicated region body
PF: predicated region fallthrough
CT: control target
= control target key end

     0   :  { %s1203_s1 = inlined_call_operand.vmem [shape: bf16[128,128], index: 1, kind: input, shape index: {}]   ;;  %s1204_s0 = inlined_call_operand.vmem [shape: bf16[256,128], index: 0, kind: input, shape index: {}]   ;;  %s1205_s3 = inlined_call_operand.vmem [shape: bf16[128,128], index: 3, kind: input, shape index: {}]   ;;  %s1206_s2 = inlined_call_operand.vmem [shape: f32[1,128], index: 2, kind: input, shape index: {}]   ;;  %s1207_s4 = inlined_call_operand.vmem [shape: f32[1,128], index: 4, kind: input, shape index: {}]   ;;  %s1208_s5 = inlined_call_operand.vmem [shape: f32[256,128], index: 5, kind: output, shape index: {}]  }
   0x1   :  { %v875_v0 = vld [vmem:[%s1203_s1] sm:$0xff]   ;;  %v876_v1 = vld [vmem:[%s1203_s1 + $0x8] sm:$0xff]   ;;  %v877_v2 = vld [vmem:[%s1203_s1 + $0x10] sm:$0xff]  }
   0x2   :  { %779 = vmatprep.subr.bf16.mxu0 %v875_v0  ;;  %v878_v3 = vld [vmem:[%s1203_s1 + $0x18] sm:$0xff]   ;;  %v883_v4 = vld [vmem:[%s1204_s0] sm:$0xff]   ;;  %v880_v6 = vld [vmem:[%s1203_s1 + $0x28] sm:$0xff]  }
   0x3   :  { %780 = vmatpush3.bf16.msra.mxu0 %v875_v0  ;;  %795 = vmatprep.mubr.bf16.mxu0 %v883_v4  ;;  %v879_v5 = vld [vmem:[%s1203_s1 + $0x20] sm:$0xff]   ;;  %v881_v7 = vld [vmem:[%s1203_s1 + $0x30] sm:$0xff]   ;;  %v882_v8 = vld [vmem:[%s1203_s1 + $0x38] sm:$0xff]  }
   0x4   :  { %781 = vmatprep.subr.bf16.mxu0 %v876_v1  ;;  %v899_v9 = vld [vmem:[%s1205_s3] sm:$0xff]   ;;  %v900_v10 = vld [vmem:[%s1205_s3 + $0x8] sm:$0xff]   ;;  %v901_v11 = vld [vmem:[%s1205_s3 + $0x10] sm:$0xff]  }
   0x5   :  { %827 = vmatprep.subr.bf16.mxu1 %v899_v9  ;;  %v884_v12 = vld [vmem:[%s1204_s0 + $0x8] sm:$0xff]   ;;  %v885_v13 = vld [vmem:[%s1204_s0 + $0x10] sm:$0xff]   ;;  %v902_v14 = vld [vmem:[%s1205_s3 + $0x18] sm:$0xff]  }
   0x6   :  { %828 = vmatpush3.bf16.msra.mxu1 %v899_v9  ;;  %v903_v15 = vld [vmem:[%s1205_s3 + $0x20] sm:$0xff]   ;;  %v886_v16 = vld [vmem:[%s1204_s0 + $0x18] sm:$0xff]   ;;  %v904_v18 = vld [vmem:[%s1205_s3 + $0x28] sm:$0xff]  }
   0x7   :  { %782 = vmatpush3.bf16.msra.mxu0 %v876_v1  ;;  %829 = vmatprep.subr.bf16.mxu1 %v900_v10  ;;  %v887_v17 = vld [vmem:[%s1204_s0 + $0x20] sm:$0xff]   ;;  %v888_v19 = vld [vmem:[%s1204_s0 + $0x28] sm:$0xff]   ;;  %v889_v20 = vld [vmem:[%s1204_s0 + $0x30] sm:$0xff]  }
   0x8   :  { %783 = vmatprep.subr.bf16.mxu0 %v877_v2  ;;  %v890_v21 = vld [vmem:[%s1204_s0 + $0x38] sm:$0xff]   ;;  %v891_v22 = vld [vmem:[%s1204_s0 + $0x40] sm:$0xff]   ;;  %v892_v23 = vld [vmem:[%s1204_s0 + $0x48] sm:$0xff]  }
   0x9   :  { %v893_v24 = vld [vmem:[%s1204_s0 + $0x50] sm:$0xff]   ;;  %v894_v25 = vld [vmem:[%s1204_s0 + $0x58] sm:$0xff]   ;;  %v895_v26 = vld [vmem:[%s1204_s0 + $0x60] sm:$0xff]  }
   0xa   :  { %830 = vmatpush3.bf16.msra.mxu1 %v900_v10  ;;  %v896_v27 = vld [vmem:[%s1204_s0 + $0x68] sm:$0xff]   ;;  %v897_v28 = vld [vmem:[%s1204_s0 + $0x70] sm:$0xff]   ;;  %v898_v29 = vld [vmem:[%s1204_s0 + $0x78] sm:$0xff]  }
   0xb   :  { %784 = vmatpush3.bf16.msra.mxu0 %v877_v2  ;;  %831 = vmatprep.subr.bf16.mxu1 %v901_v11  ;;  %v905_v30 = vld [vmem:[%s1205_s3 + $0x30] sm:$0xff]   ;;  %v906_v31 = vld [vmem:[%s1205_s3 + $0x38] sm:$0xff]   ;;  %v1036_v32 = vld [vmem:[%s1206_s2] ss:$0 sm:$0xff] }
   0xc   :  { %785 = vmatprep.subr.bf16.mxu0 %v878_v3 }
   0xe   :  { %832 = vmatpush3.bf16.msra.mxu1 %v901_v11 }
   0xf   :  { %786 = vmatpush3.bf16.msra.mxu0 %v878_v3  ;;  %833 = vmatprep.subr.bf16.mxu1 %v902_v14 }
  0x10   :  { %787 = vmatprep.subr.bf16.mxu0 %v879_v5 }
  0x12   :  { %834 = vmatpush3.bf16.msra.mxu1 %v902_v14 }
  0x13   :  { %788 = vmatpush3.bf16.msra.mxu0 %v879_v5  ;;  %835 = vmatprep.subr.bf16.mxu1 %v903_v15 }
  0x14   :  { %789 = vmatprep.subr.bf16.mxu0 %v880_v6 }
  0x16   :  { %836 = vmatpush3.bf16.msra.mxu1 %v903_v15 }
  0x17   :  { %790 = vmatpush3.bf16.msra.mxu0 %v880_v6  ;;  %837 = vmatprep.subr.bf16.mxu1 %v904_v18 }
  0x18   :  { %791 = vmatprep.subr.bf16.mxu0 %v881_v7 }
  0x1a   :  { %838 = vmatpush3.bf16.msra.mxu1 %v904_v18 }
  0x1b   :  { %792 = vmatpush3.bf16.msra.mxu0 %v881_v7  ;;  %839 = vmatprep.subr.bf16.mxu1 %v905_v30 }
  0x1c   :  { %793 = vmatprep.subr.bf16.mxu0 %v882_v8 }
  0x1e   :  { %840 = vmatpush3.bf16.msra.mxu1 %v905_v30 }
  0x1f   :  { %794 = vmatpush3.bf16.msra.mxu0 %v882_v8  ;;  %841 = vmatprep.subr.bf16.mxu1 %v906_v31 }
  0x22   :  { %796 = vmatmul.mubr.bf16.vlgmr.msra.gmra.mrb[0].mxu0 %v884_v12  ;;  %842 = vmatpush3.bf16.msra.mxu1 %v906_v31 }
  0x23   :  { %799 = vmatprep.mubr.bf16.mxu0 %v885_v13 }
  0x2a   :  { %800 = vmatmul.mubr.bf16.gmra.mrb[4].mxu0 %v886_v16 }
  0x2b   :  { %803 = vmatprep.mubr.bf16.mxu0 %v887_v17 }
  0x32   :  { %804 = vmatmul.mubr.bf16.gmra.mrb[8].mxu0 %v888_v19 }
  0x33   :  { %807 = vmatprep.mubr.bf16.mxu0 %v889_v20 }
  0x3a   :  { %808 = vmatmul.mubr.bf16.gmra.mrb[12].mxu0 %v890_v21 }
  0x3b   :  { %811 = vmatprep.mubr.bf16.mxu0 %v891_v22 }
  0x42   :  { %812 = vmatmul.mubr.bf16.gmra.mrb[16].mxu0 %v892_v23 }
  0x43   :  { %815 = vmatprep.mubr.bf16.mxu0 %v893_v24 }
  0x4a   :  { %816 = vmatmul.mubr.bf16.gmra.mrb[20].mxu0 %v894_v25 }
  0x4b   :  { %819 = vmatprep.mubr.bf16.mxu0 %v895_v26 }
  0x52   :  { %820 = vmatmul.mubr.bf16.gmra.mrb[24].mxu0 %v896_v27 }
  0x53   :  { %823 = vmatprep.mubr.bf16.mxu0 %v897_v28 }
  0x5a   :  { %824 = vmatmul.mubr.bf16.gmra.mrb[28].mxu0 %v898_v29 }
  0xf5   :  { %v797_v33 = vpop.f32.mrb[0].mxu0 }
  0xf6   :  { %v263_v34 = vadd.f32 %v797_v33, %v1036_v32  ;;  %v254_v35 = vpop.f32.mrb[1].mxu0 }
  0xf7   :  { %v255_v36 = vadd.f32 %v1036_v32, %v254_v35  ;;  %v798_v37 = vpop.f32.mrb[2].mxu0 }
  0xf8   :  { %v266_v38 = vadd.f32 %v798_v37, %v1036_v32  ;;  %v257_v39 = vpop.f32.mrb[3].mxu0  ;;  %v383_v41 = vmax.f32 %v263_v34, 0.0 }
  0xf9   :  { %v258_v40 = vadd.f32 %v1036_v32, %v257_v39  ;;  %v381_v43 = vmax.f32 %v255_v36, 0.0 }
  0xfa   :  { %v384_v42 = vmax.f32 %v266_v38, 0.0 }
  0xfb   :  { %v382_v44 = vmax.f32 %v258_v40, 0.0 }
  0xfc   :  { %v414_v45 = vpack.c.bf16 %v384_v42, %v383_v41 }
  0xfd   :  { %v801_v46 = vpop.f32.mrb[4].mxu0  ;;  %v413_v47 = vpack.c.bf16 %v382_v44, %v381_v43 }
  0xfe   :  { %v279_v48 = vadd.f32 %v801_v46, %v1036_v32  ;;  %v270_v49 = vpop.f32.mrb[5].mxu0 }
  0xff   :  { %v271_v50 = vadd.f32 %v1036_v32, %v270_v49  ;;  %v802_v51 = vpop.f32.mrb[6].mxu0  ;;  %843 = vmatprep.mubr.bf16.mxu1 %v413_v47 }
 0x100   :  { %v282_v52 = vadd.f32 %v802_v51, %v1036_v32  ;;  %v273_v53 = vpop.f32.mrb[7].mxu0  ;;  %844 = vmatmul.mubr.bf16.vlgmr.msra.gmra.mrb[0].mxu1 %v414_v45  ;;  %v387_v55 = vmax.f32 %v279_v48, 0.0 }
 0x101   :  { %v274_v54 = vadd.f32 %v1036_v32, %v273_v53  ;;  %v385_v57 = vmax.f32 %v271_v50, 0.0 }
 0x102   :  { %v388_v56 = vmax.f32 %v282_v52, 0.0 }
 0x103   :  { %v386_v58 = vmax.f32 %v274_v54, 0.0 }
 0x104   :  { %v416_v59 = vpack.c.bf16 %v388_v56, %v387_v55 }
 0x105   :  { %v415_v60 = vpack.c.bf16 %v386_v58, %v385_v57  ;;  %v805_v61 = vpop.f32.mrb[8].mxu0 }
 0x106   :  { %v295_v62 = vadd.f32 %v805_v61, %v1036_v32  ;;  %v286_v63 = vpop.f32.mrb[9].mxu0 }
 0x107   :  { %v287_v0 = vadd.f32 %v1036_v32, %v286_v63  ;;  %v806_v1 = vpop.f32.mrb[10].mxu0  ;;  %847 = vmatprep.mubr.bf16.mxu1 %v415_v60 }
 0x108   :  { %v298_v2 = vadd.f32 %v806_v1, %v1036_v32  ;;  %v289_v3 = vpop.f32.mrb[11].mxu0  ;;  %848 = vmatmul.mubr.bf16.gmra.mrb[4].mxu1 %v416_v59  ;;  %v391_v5 = vmax.f32 %v295_v62, 0.0 }
 0x109   :  { %v290_v4 = vadd.f32 %v1036_v32, %v289_v3  ;;  %v389_v7 = vmax.f32 %v287_v0, 0.0 }
 0x10a   :  { %v392_v6 = vmax.f32 %v298_v2, 0.0 }
 0x10b   :  { %v390_v8 = vmax.f32 %v290_v4, 0.0 }
 0x10c   :  { %v418_v9 = vpack.c.bf16 %v392_v6, %v391_v5 }
 0x10d   :  { %v417_v10 = vpack.c.bf16 %v390_v8, %v389_v7  ;;  %v809_v11 = vpop.f32.mrb[12].mxu0 }
 0x10e   :  { %v311_v12 = vadd.f32 %v809_v11, %v1036_v32  ;;  %v302_v13 = vpop.f32.mrb[13].mxu0 }
 0x10f   :  { %v303_v14 = vadd.f32 %v1036_v32, %v302_v13  ;;  %v810_v15 = vpop.f32.mrb[14].mxu0  ;;  %851 = vmatprep.mubr.bf16.mxu1 %v417_v10 }
 0x110   :  { %v314_v16 = vadd.f32 %v810_v15, %v1036_v32  ;;  %v305_v17 = vpop.f32.mrb[15].mxu0  ;;  %852 = vmatmul.mubr.bf16.gmra.mrb[8].mxu1 %v418_v9  ;;  %v395_v19 = vmax.f32 %v311_v12, 0.0 }
 0x111   :  { %v306_v18 = vadd.f32 %v1036_v32, %v305_v17  ;;  %v393_v21 = vmax.f32 %v303_v14, 0.0 }
 0x112   :  { %v396_v20 = vmax.f32 %v314_v16, 0.0 }
 0x113   :  { %v394_v22 = vmax.f32 %v306_v18, 0.0  ;;  %v1073_v18 = vld [vmem:[%s1207_s4] ss:$0 sm:$0xff] }
 0x114   :  { %v420_v23 = vpack.c.bf16 %v396_v20, %v395_v19 }
 0x115   :  { %v419_v24 = vpack.c.bf16 %v394_v22, %v393_v21  ;;  %v813_v25 = vpop.f32.mrb[16].mxu0 }
 0x116   :  { %v327_v26 = vadd.f32 %v813_v25, %v1036_v32  ;;  %v318_v27 = vpop.f32.mrb[17].mxu0 }
 0x117   :  { %v319_v28 = vadd.f32 %v1036_v32, %v318_v27  ;;  %v814_v29 = vpop.f32.mrb[18].mxu0  ;;  %855 = vmatprep.mubr.bf16.mxu1 %v419_v24 }
 0x118   :  { %v330_v30 = vadd.f32 %v814_v29, %v1036_v32  ;;  %v321_v31 = vpop.f32.mrb[19].mxu0  ;;  %856 = vmatmul.mubr.bf16.gmra.mrb[12].mxu1 %v420_v23  ;;  %v399_v34 = vmax.f32 %v327_v26, 0.0 }
 0x119   :  { %v322_v33 = vadd.f32 %v1036_v32, %v321_v31  ;;  %v397_v36 = vmax.f32 %v319_v28, 0.0 }
 0x11a   :  { %v400_v35 = vmax.f32 %v330_v30, 0.0 }
 0x11b   :  { %v398_v37 = vmax.f32 %v322_v33, 0.0 }
 0x11c   :  { %v422_v38 = vpack.c.bf16 %v400_v35, %v399_v34 }
 0x11d   :  { %v421_v39 = vpack.c.bf16 %v398_v37, %v397_v36  ;;  %v817_v40 = vpop.f32.mrb[20].mxu0 }
 0x11e   :  { %v343_v41 = vadd.f32 %v817_v40, %v1036_v32  ;;  %v334_v42 = vpop.f32.mrb[21].mxu0 }
 0x11f   :  { %v335_v43 = vadd.f32 %v1036_v32, %v334_v42  ;;  %v818_v44 = vpop.f32.mrb[22].mxu0  ;;  %859 = vmatprep.mubr.bf16.mxu1 %v421_v39 }
 0x120   :  { %v346_v45 = vadd.f32 %v818_v44, %v1036_v32  ;;  %v337_v46 = vpop.f32.mrb[23].mxu0  ;;  %860 = vmatmul.mubr.bf16.gmra.mrb[16].mxu1 %v422_v38  ;;  %v403_v48 = vmax.f32 %v343_v41, 0.0 }
 0x121   :  { %v338_v47 = vadd.f32 %v1036_v32, %v337_v46  ;;  %v401_v50 = vmax.f32 %v335_v43, 0.0 }
 0x122   :  { %v404_v49 = vmax.f32 %v346_v45, 0.0 }
 0x123   :  { %v402_v51 = vmax.f32 %v338_v47, 0.0 }
 0x124   :  { %v424_v52 = vpack.c.bf16 %v404_v49, %v403_v48 }
 0x125   :  { %v423_v53 = vpack.c.bf16 %v402_v51, %v401_v50  ;;  %v821_v54 = vpop.f32.mrb[24].mxu0 }
 0x126   :  { %v359_v55 = vadd.f32 %v821_v54, %v1036_v32  ;;  %v350_v56 = vpop.f32.mrb[25].mxu0 }
 0x127   :  { %v351_v57 = vadd.f32 %v1036_v32, %v350_v56  ;;  %v822_v58 = vpop.f32.mrb[26].mxu0  ;;  %863 = vmatprep.mubr.bf16.mxu1 %v423_v53 }
 0x128   :  { %v362_v59 = vadd.f32 %v822_v58, %v1036_v32  ;;  %v353_v60 = vpop.f32.mrb[27].mxu0  ;;  %864 = vmatmul.mubr.bf16.gmra.mrb[20].mxu1 %v424_v52  ;;  %v407_v62 = vmax.f32 %v359_v55, 0.0 }
 0x129   :  { %v354_v61 = vadd.f32 %v1036_v32, %v353_v60  ;;  %v405_v0 = vmax.f32 %v351_v57, 0.0 }
 0x12a   :  { %v408_v63 = vmax.f32 %v362_v59, 0.0 }
 0x12b   :  { %v406_v1 = vmax.f32 %v354_v61, 0.0 }
 0x12c   :  { %v426_v2 = vpack.c.bf16 %v408_v63, %v407_v62 }
 0x12d   :  { %v425_v3 = vpack.c.bf16 %v406_v1, %v405_v0  ;;  %v825_v4 = vpop.f32.mrb[28].mxu0 }
 0x12e   :  { %v375_v5 = vadd.f32 %v825_v4, %v1036_v32  ;;  %v366_v6 = vpop.f32.mrb[29].mxu0 }
 0x12f   :  { %v367_v7 = vadd.f32 %v1036_v32, %v366_v6  ;;  %v826_v8 = vpop.f32.mrb[30].mxu0  ;;  %867 = vmatprep.mubr.bf16.mxu1 %v425_v3 }
 0x130   :  { %v378_v9 = vadd.f32 %v826_v8, %v1036_v32  ;;  %v369_v10 = vpop.f32.mrb[31].mxu0  ;;  %868 = vmatmul.mubr.bf16.gmra.mrb[24].mxu1 %v426_v2  ;;  %v411_v12 = vmax.f32 %v375_v5, 0.0 }
 0x131   :  { %v370_v11 = vadd.f32 %v1036_v32, %v369_v10  ;;  %v409_v14 = vmax.f32 %v367_v7, 0.0 }
 0x132   :  { %v412_v13 = vmax.f32 %v378_v9, 0.0 }
 0x133   :  { %v410_v15 = vmax.f32 %v370_v11, 0.0 }
 0x134   :  { %v428_v16 = vpack.c.bf16 %v412_v13, %v411_v12 }
 0x135   :  { %v427_v17 = vpack.c.bf16 %v410_v15, %v409_v14 }
 0x137   :  { %871 = vmatprep.mubr.bf16.mxu1 %v427_v17 }
 0x138   :  { %872 = vmatmul.mubr.bf16.gmra.mrb[28].mxu1 %v428_v16 }
 0x1d3   :  { %v845_v19 = vpop.f32.mrb[0].mxu1 }
 0x1d4   :  { %v543_v20 = vadd.f32 %v845_v19, %v1073_v18  ;;  %v534_v21 = vpop.f32.mrb[1].mxu1 }
 0x1d5   :  { %v535_v22 = vadd.f32 %v1073_v18, %v534_v21  ;;  %v846_v32 = vpop.f32.mrb[2].mxu1 }
 0x1d6   :  { %663 = vst [vmem:[%s1208_s5 + $0x10] sm:$0xff] %v543_v20  ;;  %v546_v23 = vadd.f32 %v846_v32, %v1073_v18  ;;  %v537_v24 = vpop.f32.mrb[3].mxu1 }
 0x1d7   :  { %661 = vst [vmem:[%s1208_s5] sm:$0xff] %v535_v22  ;;  %v538_v25 = vadd.f32 %v1073_v18, %v537_v24 }
 0x1d8   :  { %664 = vst [vmem:[%s1208_s5 + $0x18] sm:$0xff] %v546_v23 }
 0x1d9   :  { %662 = vst [vmem:[%s1208_s5 + $0x8] sm:$0xff] %v538_v25 }
 0x1db   :  { %v849_v26 = vpop.f32.mrb[4].mxu1 }
 0x1dc   :  { %v559_v27 = vadd.f32 %v849_v26, %v1073_v18  ;;  %v550_v28 = vpop.f32.mrb[5].mxu1 }
 0x1dd   :  { %v551_v29 = vadd.f32 %v1073_v18, %v550_v28  ;;  %v850_v30 = vpop.f32.mrb[6].mxu1 }
 0x1de   :  { %667 = vst [vmem:[%s1208_s5 + $0x30] sm:$0xff] %v559_v27  ;;  %v562_v31 = vadd.f32 %v850_v30, %v1073_v18  ;;  %v553_v33 = vpop.f32.mrb[7].mxu1 }
 0x1df   :  { %665 = vst [vmem:[%s1208_s5 + $0x20] sm:$0xff] %v551_v29  ;;  %v554_v34 = vadd.f32 %v1073_v18, %v553_v33 }
 0x1e0   :  { %668 = vst [vmem:[%s1208_s5 + $0x38] sm:$0xff] %v562_v31 }
 0x1e1   :  { %666 = vst [vmem:[%s1208_s5 + $0x28] sm:$0xff] %v554_v34 }
 0x1e3   :  { %v853_v35 = vpop.f32.mrb[8].mxu1 }
 0x1e4   :  { %v575_v36 = vadd.f32 %v853_v35, %v1073_v18  ;;  %v566_v37 = vpop.f32.mrb[9].mxu1 }
 0x1e5   :  { %v567_v38 = vadd.f32 %v1073_v18, %v566_v37  ;;  %v854_v39 = vpop.f32.mrb[10].mxu1 }
 0x1e6   :  { %671 = vst [vmem:[%s1208_s5 + $0x50] sm:$0xff] %v575_v36  ;;  %v578_v40 = vadd.f32 %v854_v39, %v1073_v18  ;;  %v569_v41 = vpop.f32.mrb[11].mxu1 }
 0x1e7   :  { %669 = vst [vmem:[%s1208_s5 + $0x40] sm:$0xff] %v567_v38  ;;  %v570_v42 = vadd.f32 %v1073_v18, %v569_v41 }
 0x1e8   :  { %672 = vst [vmem:[%s1208_s5 + $0x58] sm:$0xff] %v578_v40 }
 0x1e9   :  { %670 = vst [vmem:[%s1208_s5 + $0x48] sm:$0xff] %v570_v42 }
 0x1eb   :  { %v857_v43 = vpop.f32.mrb[12].mxu1 }
 0x1ec   :  { %v591_v44 = vadd.f32 %v857_v43, %v1073_v18  ;;  %v582_v45 = vpop.f32.mrb[13].mxu1 }
 0x1ed   :  { %v583_v46 = vadd.f32 %v1073_v18, %v582_v45  ;;  %v858_v47 = vpop.f32.mrb[14].mxu1 }
 0x1ee   :  { %675 = vst [vmem:[%s1208_s5 + $0x70] sm:$0xff] %v591_v44  ;;  %v594_v48 = vadd.f32 %v858_v47, %v1073_v18  ;;  %v585_v49 = vpop.f32.mrb[15].mxu1 }
 0x1ef   :  { %673 = vst [vmem:[%s1208_s5 + $0x60] sm:$0xff] %v583_v46  ;;  %v586_v50 = vadd.f32 %v1073_v18, %v585_v49 }
 0x1f0   :  { %676 = vst [vmem:[%s1208_s5 + $0x78] sm:$0xff] %v594_v48 }
 0x1f1   :  { %674 = vst [vmem:[%s1208_s5 + $0x68] sm:$0xff] %v586_v50 }
 0x1f3   :  { %v861_v51 = vpop.f32.mrb[16].mxu1 }
 0x1f4   :  { %v607_v52 = vadd.f32 %v861_v51, %v1073_v18  ;;  %v598_v53 = vpop.f32.mrb[17].mxu1 }
 0x1f5   :  { %v599_v54 = vadd.f32 %v1073_v18, %v598_v53  ;;  %v862_v55 = vpop.f32.mrb[18].mxu1 }
 0x1f6   :  { %679 = vst [vmem:[%s1208_s5 + $0x90] sm:$0xff] %v607_v52  ;;  %v610_v56 = vadd.f32 %v862_v55, %v1073_v18  ;;  %v601_v57 = vpop.f32.mrb[19].mxu1 }
 0x1f7   :  { %677 = vst [vmem:[%s1208_s5 + $0x80] sm:$0xff] %v599_v54  ;;  %v602_v58 = vadd.f32 %v1073_v18, %v601_v57 }
 0x1f8   :  { %680 = vst [vmem:[%s1208_s5 + $0x98] sm:$0xff] %v610_v56 }
 0x1f9   :  { %678 = vst [vmem:[%s1208_s5 + $0x88] sm:$0xff] %v602_v58 }
 0x1fb   :  { %v865_v59 = vpop.f32.mrb[20].mxu1 }
 0x1fc   :  { %v623_v60 = vadd.f32 %v865_v59, %v1073_v18  ;;  %v614_v61 = vpop.f32.mrb[21].mxu1 }
 0x1fd   :  { %v615_v62 = vadd.f32 %v1073_v18, %v614_v61  ;;  %v866_v63 = vpop.f32.mrb[22].mxu1 }
 0x1fe   :  { %683 = vst [vmem:[%s1208_s5 + $0xb0] sm:$0xff] %v623_v60  ;;  %v626_v0 = vadd.f32 %v866_v63, %v1073_v18  ;;  %v617_v1 = vpop.f32.mrb[23].mxu1 }
 0x1ff   :  { %681 = vst [vmem:[%s1208_s5 + $0xa0] sm:$0xff] %v615_v62  ;;  %v618_v2 = vadd.f32 %v1073_v18, %v617_v1 }
 0x200   :  { %684 = vst [vmem:[%s1208_s5 + $0xb8] sm:$0xff] %v626_v0 }
 0x201   :  { %682 = vst [vmem:[%s1208_s5 + $0xa8] sm:$0xff] %v618_v2 }
 0x203   :  { %v869_v3 = vpop.f32.mrb[24].mxu1 }
 0x204   :  { %v639_v4 = vadd.f32 %v869_v3, %v1073_v18  ;;  %v630_v5 = vpop.f32.mrb[25].mxu1 }
 0x205   :  { %v631_v6 = vadd.f32 %v1073_v18, %v630_v5  ;;  %v870_v7 = vpop.f32.mrb[26].mxu1 }
 0x206   :  { %687 = vst [vmem:[%s1208_s5 + $0xd0] sm:$0xff] %v639_v4  ;;  %v642_v8 = vadd.f32 %v870_v7, %v1073_v18  ;;  %v633_v9 = vpop.f32.mrb[27].mxu1 }
 0x207   :  { %685 = vst [vmem:[%s1208_s5 + $0xc0] sm:$0xff] %v631_v6  ;;  %v634_v10 = vadd.f32 %v1073_v18, %v633_v9 }
 0x208   :  { %688 = vst [vmem:[%s1208_s5 + $0xd8] sm:$0xff] %v642_v8 }
 0x209   :  { %686 = vst [vmem:[%s1208_s5 + $0xc8] sm:$0xff] %v634_v10 }
 0x20b   :  { %v873_v11 = vpop.f32.mrb[28].mxu1 }
 0x20c   :  { %v655_v12 = vadd.f32 %v873_v11, %v1073_v18  ;;  %v646_v13 = vpop.f32.mrb[29].mxu1 }
 0x20d   :  { %v647_v14 = vadd.f32 %v1073_v18, %v646_v13  ;;  %v874_v15 = vpop.f32.mrb[30].mxu1 }
 0x20e   :  { %691 = vst [vmem:[%s1208_s5 + $0xf0] sm:$0xff] %v655_v12  ;;  %v658_v16 = vadd.f32 %v874_v15, %v1073_v18  ;;  %v649_v17 = vpop.f32.mrb[31].mxu1 }
 0x20f   :  { %689 = vst [vmem:[%s1208_s5 + $0xe0] sm:$0xff] %v647_v14  ;;  %v650_v19 = vadd.f32 %v1073_v18, %v649_v17 }
 0x210   :  { %692 = vst [vmem:[%s1208_s5 + $0xf8] sm:$0xff] %v658_v16 }
 0x211   :  { %690 = vst [vmem:[%s1208_s5 + $0xe8] sm:$0xff] %v650_v19 }

</bundles_post_ra>
